<compile_context>
chip_gen: v5e
topology: v5e:2x2
jax: 0.10.0
libtpu: 0.0.40
codegen_flags: <defaults>
</compile_context>

<pallas_src>
import jax
import jax.numpy as jnp
from jax.experimental import pallas as pl
from jax.experimental.pallas import tpu as pltpu


def residual_kernel(x_ref, w1_ref, b1_ref, a1_ref, w2_ref, b2_ref, a2_ref, o_ref):
    # x block: (Nb, C_in, tp) -- channels on sublanes, pixels lane-dense.
    w1 = w1_ref[...]          # (C_mid, C_in)   compute dtype
    b1 = b1_ref[...]          # (C_mid, 1)      f32
    a1 = a1_ref[...]          # (C_mid, 1)      f32
    w2 = w2_ref[...]          # (C_in, C_mid)   compute dtype, pre-scaled by 0.5
    b2 = b2_ref[...]          # (C_in, 1)       f32, pre-scaled by 0.5
    a2 = a2_ref[...]          # (C_in, 1)       f32

    nb = x_ref.shape[0]
    # Small static unroll over the images in this block.  The two 1x1 convs
    # are tiny per-image matmuls; at small C they use only a sliver of the MXU
    # but the kernel is HBM-bound once the tiles are sized right, so jnp.dot
    # is kept (it also stays correct if channel counts grow into MXU regime).
    for b in range(nb):
        x = x_ref[b]                                               # (C_in, tp)
        h = jnp.dot(w1, x, preferred_element_type=jnp.float32) + b1
        h = jnp.where(h >= 0.0, h, a1 * h)                         # PReLU-1
        r = jnp.dot(w2, h.astype(w2.dtype),
                    preferred_element_type=jnp.float32) + b2       # already *0.5
        out = 0.5 * x.astype(jnp.float32) + r                      # (x + conv2)/2
        out = jnp.where(out >= 0.0, out, a2 * out)                 # PReLU-2
        o_ref[b] = out.astype(o_ref.dtype)


def _choose_tiles(N, C_in, C_mid, P, itemsize):
    """Pick (images/block, pixels/block): ~TARGET bytes of streamed input per
    grid step, working set well inside v7x's 64 MiB VMEM, and >= 4 grid steps
    when the problem is big enough (two v7x TensorCores)."""
    TARGET = 2 << 20          # ~2 MB of input per grid step
    BUDGET = 32 << 20         # VMEM working-set budget (safe on 64 MiB v7x)

    # Pixel tile: full dim if P <= 128 (no ragged tile at all), otherwise a
    # multiple of 128 that never exceeds P (only the final cdiv tile is ragged).
    if P <= 128:
        tp = P
    else:
        lane_cap = (P // 128) * 128
        tp = max(1, TARGET // max(1, C_in * itemsize))
        tp = max(128, (tp // 128) * 128)
        tp = min(tp, lane_cap)

    # Fold whole images into the block (Nb divides N) if one image's pixel
    # tile alone is far below the byte target.
    per_img = C_in * tp * itemsize
    nb_cap = max(1, TARGET // max(1, per_img))
    Nb = 1
    for d in range(1, N + 1):
        if N % d == 0 and d <= nb_cap:
            Nb = d

    def vmem_need(nb, t):
        io = 2 * 2 * nb * C_in * t * itemsize          # in + out, double buffered
        tmp = nb * (2 * C_in + C_mid) * t * 4          # f32 temporaries
        params = (2 * C_mid * C_in + 2 * (C_mid + C_in)) * 4
        return io + tmp + params

    def smaller_divisor(n, d):
        cands = [k for k in range(1, d) if n % k == 0]
        return cands[-1] if cands else 1

    # Stay inside the VMEM budget.
    while vmem_need(Nb, tp) > BUDGET and (tp > 128 or Nb > 1):
        if tp > 128:
            tp = max(128, ((tp // 2) // 128) * 128)
        else:
            Nb = smaller_divisor(N, Nb)

    # Prefer >= 4 grid steps so both v7x TensorCores get work.
    def n_steps(nb, t):
        return (-(-N // nb)) * (-(-P // t))
    while n_steps(Nb, tp) < 4 and (tp > 128 or Nb > 1):
        if tp > 128:
            tp = max(128, ((tp // 2 + 127) // 128) * 128)
        else:
            Nb = smaller_divisor(N, Nb)

    return Nb, tp, vmem_need(Nb, tp)


def residual_module(x_nchw, w1, b1, alpha1, w2, b2, alpha2):
    """x_nchw: (N, C_in, H, W).  w1: (C_mid, C_in), w2: (C_in, C_mid)."""
    N, C_in, H, W = x_nchw.shape
    C_mid = w1.shape[0]
    P = H * W

    comp_dt = x_nchw.dtype
    if comp_dt not in (jnp.float32, jnp.bfloat16):
        comp_dt = jnp.float32

    # Lane-dense channel-major layout: free reshape, no transpose, no pad.
    x3d = x_nchw.reshape(N, C_in, P)
    if x3d.dtype != comp_dt:
        x3d = x3d.astype(comp_dt)

    # Params: channels on sublanes, broadcast over the lane (pixel) dim.
    # The residual /2 is folded into conv2's weight and bias.
    w1_m = w1.astype(comp_dt)                                    # (C_mid, C_in)
    w2_m = (0.5 * w2.astype(jnp.float32)).astype(comp_dt)        # (C_in, C_mid)
    b1_c = b1.reshape(C_mid, 1).astype(jnp.float32)
    b2_c = (0.5 * b2.astype(jnp.float32)).reshape(C_in, 1)
    a1_c = alpha1.reshape(C_mid, 1).astype(jnp.float32)
    a2_c = alpha2.reshape(C_in, 1).astype(jnp.float32)

    itemsize = jnp.dtype(comp_dt).itemsize
    Nb, tp, vneed = _choose_tiles(N, C_in, C_mid, P, itemsize)
    grid = (pl.cdiv(N, Nb), pl.cdiv(P, tp))
    const = lambda n, p: (0, 0)

    out3d = pl.pallas_call(
        residual_kernel,
        out_shape=jax.ShapeDtypeStruct((N, C_in, P), x3d.dtype),
        grid=grid,
        in_specs=[
            pl.BlockSpec((Nb, C_in, tp), lambda n, p: (n, 0, p)),  # x block
            pl.BlockSpec((C_mid, C_in), const),                    # W1
            pl.BlockSpec((C_mid, 1), const),                       # b1
            pl.BlockSpec((C_mid, 1), const),                       # alpha1
            pl.BlockSpec((C_in, C_mid), const),                    # W2 (*0.5)
            pl.BlockSpec((C_in, 1), const),                        # b2 (*0.5)
            pl.BlockSpec((C_in, 1), const),                        # alpha2
        ],
        out_specs=pl.BlockSpec((Nb, C_in, tp), lambda n, p: (n, 0, p)),
        compiler_params=pltpu.CompilerParams(
            dimension_semantics=("parallel", "parallel"),
            vmem_limit_bytes=int(min(48 << 20, max(2 * vneed, 24 << 20)))),
    )(x3d, w1_m, b1_c, a1_c, w2_m, b2_c, a2_c)

    return out3d.reshape(N, C_in, H, W)


def _reference(x, w1, b1, a1, w2, b2, a2):
    # Plain-JAX reference of the PyTorch forward.
    N, C, H, W = x.shape
    x2 = jnp.transpose(x, (0, 2, 3, 1)).reshape(-1, C)
    h = x2 @ w1.T + b1
    h = jnp.maximum(h, 0) + a1 * jnp.minimum(h, 0)
    r = h @ w2.T + b2
    o = (x2 + r) / 2.0
    o = jnp.maximum(o, 0) + a2 * jnp.minimum(o, 0)
    return jnp.transpose(o.reshape(N, H, W, C), (0, 3, 1, 2))


def _check(N, C_in, H, W, mul, key, nonzero_alpha):
    C_mid = C_in * mul
    ks = jax.random.split(key, 8)
    x = jax.random.normal(ks[0], (N, C_in, H, W), dtype=jnp.float32)
    w1 = jax.random.normal(ks[1], (C_mid, C_in), dtype=jnp.float32) * 0.2
    b1 = jax.random.normal(ks[2], (C_mid,), dtype=jnp.float32) * 0.1
    w2 = jax.random.normal(ks[3], (C_in, C_mid), dtype=jnp.float32) * 0.2
    b2 = jax.random.normal(ks[4], (C_in,), dtype=jnp.float32) * 0.1
    if nonzero_alpha:
        # exercise the negative-slope PReLU path (alpha is a learnable param)
        alpha1 = jax.random.normal(ks[5], (C_mid,), dtype=jnp.float32) * 0.3
        alpha2 = jax.random.normal(ks[6], (C_in,), dtype=jnp.float32) * 0.3
    else:
        # nn.PReLU(num_params, 0) init: per-channel slope = 0
        alpha1 = jnp.zeros((C_mid,), dtype=jnp.float32)
        alpha2 = jnp.zeros((C_in,), dtype=jnp.float32)

    out = jax.block_until_ready(
        residual_module(x, w1, b1, alpha1, w2, b2, alpha2))
    ref = _reference(x, w1, b1, alpha1, w2, b2, alpha2)
    assert out.shape == (N, C_in, H, W)
    assert jnp.allclose(out, ref, atol=1e-5, rtol=1e-5)


if __name__ == "__main__":
    key = jax.random.PRNGKey(0)
    k0, k1, k2 = jax.random.split(key, 3)

    # as-initialized module (alpha = 0)
    _check(N=2, C_in=4, H=16, W=16, mul=2, key=k0, nonzero_alpha=False)
    # nonzero per-channel PReLU slopes (negative path exercised)
    _check(N=2, C_in=4, H=16, W=16, mul=2, key=k1, nonzero_alpha=True)
    # ragged spatial size (H*W = 100 < 128 -> full-dim pixel tile, no padding)
    _check(N=2, C_in=4, H=10, W=10, mul=2, key=k2, nonzero_alpha=True)

    print("KERNEL_OK")
</pallas_src>

<mosaic_0001>
module attributes {stable_mosaic.version = 11 : i64} {
  func.func @residual_kernel(%arg0: i32, %arg1: i32, %arg2: memref<1x4x128xf32, #tpu.memory_space<vmem>>, %arg3: memref<8x4xf32, #tpu.memory_space<vmem>>, %arg4: memref<8x1xf32, #tpu.memory_space<vmem>>, %arg5: memref<8x1xf32, #tpu.memory_space<vmem>>, %arg6: memref<4x8xf32, #tpu.memory_space<vmem>>, %arg7: memref<4x1xf32, #tpu.memory_space<vmem>>, %arg8: memref<4x1xf32, #tpu.memory_space<vmem>>, %arg9: memref<1x4x128xf32, #tpu.memory_space<vmem>>) attributes {dimension_semantics = [#tpu.dimension_semantics<parallel>, #tpu.dimension_semantics<parallel>], iteration_bounds = array<i64: 2, 2>, scalar_prefetch = 0 : i64, scratch_operands = 0 : i64, tpu.core_type = #tpu.core_type<tc>, window_params = [{transform_indices = @transform_0, window_bounds = array<i64: 1, 4, 128>}, {pipeline_mode = #tpu.pipeline_mode<synchronous>, transform_indices = @transform_1, window_bounds = array<i64: 8, 4>}, {pipeline_mode = #tpu.pipeline_mode<synchronous>, transform_indices = @transform_2, window_bounds = array<i64: 8, 1>}, {pipeline_mode = #tpu.pipeline_mode<synchronous>, transform_indices = @transform_3, window_bounds = array<i64: 8, 1>}, {pipeline_mode = #tpu.pipeline_mode<synchronous>, transform_indices = @transform_4, window_bounds = array<i64: 4, 8>}, {pipeline_mode = #tpu.pipeline_mode<synchronous>, transform_indices = @transform_5, window_bounds = array<i64: 4, 1>}, {pipeline_mode = #tpu.pipeline_mode<synchronous>, transform_indices = @transform_6, window_bounds = array<i64: 4, 1>}, {transform_indices = @transform_7, window_bounds = array<i64: 1, 4, 128>}]} {
    %c0 = arith.constant 0 : index
    %c0_0 = arith.constant 0 : index
    %0 = vector.load %arg3[%c0, %c0_0] : memref<8x4xf32, #tpu.memory_space<vmem>>, vector<8x4xf32>
    %c0_1 = arith.constant 0 : index
    %c0_2 = arith.constant 0 : index
    %1 = vector.load %arg4[%c0_1, %c0_2] : memref<8x1xf32, #tpu.memory_space<vmem>>, vector<8x1xf32>
    %c0_3 = arith.constant 0 : index
    %c0_4 = arith.constant 0 : index
    %2 = vector.load %arg5[%c0_3, %c0_4] : memref<8x1xf32, #tpu.memory_space<vmem>>, vector<8x1xf32>
    %c0_5 = arith.constant 0 : index
    %c0_6 = arith.constant 0 : index
    %3 = vector.load %arg6[%c0_5, %c0_6] : memref<4x8xf32, #tpu.memory_space<vmem>>, vector<4x8xf32>
    %c0_7 = arith.constant 0 : index
    %c0_8 = arith.constant 0 : index
    %4 = vector.load %arg7[%c0_7, %c0_8] : memref<4x1xf32, #tpu.memory_space<vmem>>, vector<4x1xf32>
    %c0_9 = arith.constant 0 : index
    %c0_10 = arith.constant 0 : index
    %5 = vector.load %arg8[%c0_9, %c0_10] : memref<4x1xf32, #tpu.memory_space<vmem>>, vector<4x1xf32>
    %c0_11 = arith.constant 0 : index
    %c0_12 = arith.constant 0 : index
    %c0_13 = arith.constant 0 : index
    %6 = vector.load %arg2[%c0_11, %c0_12, %c0_13] : memref<1x4x128xf32, #tpu.memory_space<vmem>>, vector<1x4x128xf32>
    %7 = vector.shape_cast %6 : vector<1x4x128xf32> to vector<4x128xf32>
    %cst = arith.constant dense<0.000000e+00> : vector<8x128xf32>
    %8 = tpu.matmul %0, %7, %cst {dimension_numbers = #tpu.dot_dimension_numbers<[1], [0], [0], [1], [0, 0, 1, 1], [], []>} : vector<8x4xf32>, vector<4x128xf32>, vector<8x128xf32> -> vector<8x128xf32>
    %9 = vector.broadcast %1 : vector<8x1xf32> to vector<8x128xf32>
    %10 = arith.addf %8, %9 : vector<8x128xf32>
    %cst_14 = arith.constant 0.000000e+00 : f32
    %11 = vector.broadcast %cst_14 : f32 to vector<8x128xf32>
    %12 = arith.cmpf oge, %10, %11 : vector<8x128xf32>
    %13 = vector.broadcast %2 : vector<8x1xf32> to vector<8x128xf32>
    %14 = arith.mulf %13, %10 : vector<8x128xf32>
    %15 = arith.select %12, %10, %14 : vector<8x128xi1>, vector<8x128xf32>
    %cst_15 = arith.constant dense<0.000000e+00> : vector<4x128xf32>
    %16 = tpu.matmul %3, %15, %cst_15 {dimension_numbers = #tpu.dot_dimension_numbers<[1], [0], [0], [1], [0, 0, 1, 1], [], []>} : vector<4x8xf32>, vector<8x128xf32>, vector<4x128xf32> -> vector<4x128xf32>
    %17 = vector.broadcast %4 : vector<4x1xf32> to vector<4x128xf32>
    %18 = arith.addf %16, %17 : vector<4x128xf32>
    %cst_16 = arith.constant 5.000000e-01 : f32
    %19 = vector.broadcast %cst_16 : f32 to vector<4x128xf32>
    %20 = arith.mulf %19, %7 : vector<4x128xf32>
    %21 = arith.addf %20, %18 : vector<4x128xf32>
    %cst_17 = arith.constant 0.000000e+00 : f32
    %22 = vector.broadcast %cst_17 : f32 to vector<4x128xf32>
    %23 = arith.cmpf oge, %21, %22 : vector<4x128xf32>
    %24 = vector.broadcast %5 : vector<4x1xf32> to vector<4x128xf32>
    %25 = arith.mulf %24, %21 : vector<4x128xf32>
    %26 = arith.select %23, %21, %25 : vector<4x128xi1>, vector<4x128xf32>
    %c0_18 = arith.constant 0 : index
    %c0_19 = arith.constant 0 : index
    %c0_20 = arith.constant 0 : index
    %27 = vector.load %arg9[%c0_18, %c0_19, %c0_20] : memref<1x4x128xf32, #tpu.memory_space<vmem>>, vector<1x4x128xf32>
    %28 = vector.shape_cast %27 : vector<1x4x128xf32> to vector<4x128xf32>
    %29 = vector.shape_cast %26 : vector<4x128xf32> to vector<1x4x128xf32>
    tpu.vector_store %arg9[%c0_18, %c0_19, %c0_20], %29 {strides = array<i32>} : memref<1x4x128xf32, #tpu.memory_space<vmem>>, vector<1x4x128xf32>,
    return
  }
  func.func @transform_0(%arg0: i32, %arg1: i32) -> (i32, i32, i32) {
    %c0_i32 = arith.constant 0 : i32
    %c0_i32_0 = arith.constant 0 : i32
    return %arg0, %c0_i32, %arg1 : i32, i32, i32
  }
  func.func @transform_1(%arg0: i32, %arg1: i32) -> (i32, i32) {
    %c0_i32 = arith.constant 0 : i32
    %c0_i32_0 = arith.constant 0 : i32
    %c0_i32_1 = arith.constant 0 : i32
    return %c0_i32, %c0_i32_0 : i32, i32
  }
  func.func @transform_2(%arg0: i32, %arg1: i32) -> (i32, i32) {
    %c0_i32 = arith.constant 0 : i32
    %c0_i32_0 = arith.constant 0 : i32
    %c0_i32_1 = arith.constant 0 : i32
    return %c0_i32, %c0_i32_0 : i32, i32
  }
  func.func @transform_3(%arg0: i32, %arg1: i32) -> (i32, i32) {
    %c0_i32 = arith.constant 0 : i32
    %c0_i32_0 = arith.constant 0 : i32
    %c0_i32_1 = arith.constant 0 : i32
    return %c0_i32, %c0_i32_0 : i32, i32
  }
  func.func @transform_4(%arg0: i32, %arg1: i32) -> (i32, i32) {
    %c0_i32 = arith.constant 0 : i32
    %c0_i32_0 = arith.constant 0 : i32
    %c0_i32_1 = arith.constant 0 : i32
    return %c0_i32, %c0_i32_0 : i32, i32
  }
  func.func @transform_5(%arg0: i32, %arg1: i32) -> (i32, i32) {
    %c0_i32 = arith.constant 0 : i32
    %c0_i32_0 = arith.constant 0 : i32
    %c0_i32_1 = arith.constant 0 : i32
    return %c0_i32, %c0_i32_0 : i32, i32
  }
  func.func @transform_6(%arg0: i32, %arg1: i32) -> (i32, i32) {
    %c0_i32 = arith.constant 0 : i32
    %c0_i32_0 = arith.constant 0 : i32
    %c0_i32_1 = arith.constant 0 : i32
    return %c0_i32, %c0_i32_0 : i32, i32
  }
  func.func @transform_7(%arg0: i32, %arg1: i32) -> (i32, i32, i32) {
    %c0_i32 = arith.constant 0 : i32
    %c0_i32_0 = arith.constant 0 : i32
    return %arg0, %c0_i32, %arg1 : i32, i32, i32
  }
}

</mosaic_0001>

<bundles_post_ra>
// kernel: tpu_custom_call.1
= control target key start
LH: loop header
LB: loop body
LE: loop exit
PB: predicated region body
PF: predicated region fallthrough
CT: control target
= control target key end

     0   :  { %s853_s0 = inlined_call_operand.vmem [shape: f32[2,4,256], index: 0, kind: input, shape index: {}]   ;;  %s854_s1 = inlined_call_operand.vmem [shape: f32[8,4], index: 1, kind: input, shape index: {}]   ;;  %s855_s2 = inlined_call_operand.vmem [shape: f32[8,1], index: 2, kind: input, shape index: {}]   ;;  %s856_s3 = inlined_call_operand.vmem [shape: f32[8,1], index: 3, kind: input, shape index: {}]   ;;  %s857_s4 = inlined_call_operand.vmem [shape: f32[4,8], index: 4, kind: input, shape index: {}]   ;;  %s858_s5 = inlined_call_operand.vmem [shape: f32[4,1], index: 5, kind: input, shape index: {}]   ;;  %s859_s6 = inlined_call_operand.vmem [shape: f32[4,1], index: 6, kind: input, shape index: {}]   ;;  %s860_s7 = inlined_call_operand.hbm [shape: f32[2,4,256], index: 7, kind: output, shape index: {}]  }
   0x1   :  { %862 = sst [smem:[#allocation6_spill]] %s855_s2 }
   0x2   :  { %12 = vsyncpa [#allocation3], 0 }
   0x3   :  { %14 = vsyncpa [#allocation3 + $0x1], 0  ;;  %s713_s24 = smov 0   ;;  %s715_s25 = smov 0  }
   0x4   :  { %s717_s26 = smov 0   ;;  %s719_s27 = smov 0  }
   0x5   :  { %s721_s28 = smov 0   ;;  %s723_s29 = smov 0  }
   0x6   :  { %s725_s30 = smov 0   ;;  %s727_s8 = smov 0  }
   0x7 LB: > { %s486_s9 = sadd.s32 4294967295, %s670_s8   ;;  %s487_s10 = sadd.s32 4294967294, %s670_s8   ;;  %s670_s8 = sphi %s727_s8, %s20_s8   ;;  %s666_s30 = sphi %s725_s30, %s874_s30   ;;  %s662_s29 = sphi %s723_s29, %s873_s29   ;;  %s658_s28 = sphi %s721_s28, %s872_s28   ;;  %s654_s27 = sphi %s719_s27, %s871_s27   ;;  %s650_s26 = sphi %s717_s26, %s870_s26   ;;  %s646_s25 = sphi %s715_s25, %s869_s25   ;;  %s642_s24 = sphi %s713_s24, %s868_s24  }
   0x8   : > { %s29_s11 = sadd.s32 1, %s662_s29  ;;  %s32_s12 = sadd.s32 1, %s666_s30 }
   0x9   : > { %p30_p0 = scmp.ge.s32.totalorder %s29_s11, 2  ;;  %p205_p1 = scmp.ne.s32.totalorder %s650_s26, %s646_s25 }
   0xa   : > { %p206_p2 = scmp.eq.s32.totalorder %s486_s9, 3  ;;  %p211_p5 = scmp.ne.s32.totalorder %s646_s25, %s642_s24 }
   0xb   : > { %s876_s11 = smov (%p30_p0, %s29_s11), 0  ;;  %s878_s12 = smov (!%p30_p0, %s32_s12), %s666_s30 }
   0xc   : > { %s191_s13 = ssub.s32 %s662_s29, %s876_s11  ;;  %p764_p3 = por %p206_p2, %p205_p1 }
   0xd   : > { %p34_p4 = scmp.ge.s32.totalorder %s878_s12, 2  ;;  %p212_p6 = scmp.eq.s32.totalorder %s487_s10, 3 }
   0xe   : > { %p490_p7 = scmp.ge.s32.totalorder %s670_s8, 1  ;;  %p259_p9 = scmp.lt.s32.totalorder %s670_s8, 5 }
   0xf   : > { %s880_s12 = smov (%p34_p4, %s878_s12), 0  ;;  %p773_p8 = por %p212_p6, %p211_p5 }
  0x10   : > { %864 = sst [smem:[#allocation5_spill]] %s880_s12  ;;  %s190_s16 = ssub.s32 %s666_s30, %s880_s12 }
  0x11   : > { %s195_s17 = sadd.s32 1, %s650_s26  ;;  %s192_s18 = sor.u32 %s191_s13, %s190_s16 }
  0x12   : > { %p260_p10 = pnand %p490_p7, %p259_p9  ;;  %p193_p11 = scmp.eq.s32.totalorder %s192_s18, 0 }
  0x13   : > { %s866_s2 = sld [smem:[#allocation6_spill]] (!%p260_p10)  ;;  %p294_p12 = scmp.lt.s32.totalorder (!%p260_p10), %s658_s28, 1 }
  0x14   : > { %s782_s19 = scalar_select %p193_p11, %s650_s26, %s195_s17  }
  0x15   : > { %263 = sbr.rel (%p260_p10) target bundleno = 302 (0x12e), region = 48  ;;  %p296_p13 = scmp.lt.s32.totalorder (!%p260_p10), %s654_s27, 1 }
  0x16   : > { %s291_s16 = sand.u32 (!%p260_p10), 1, %s646_s25  }
  0x1a   : > { %v303_v0 = vld [vmem:[%s866_s2] sm:$0xff]  ;;  %v672_v1 = vmov 0   ;;  %s295_s22 = scalar_select %p294_p12, %s658_s28, 1  ;;  %vm318_vm0 = vcmask 1043456   ;;  %vm314_vm1 = vcmask 31744   ;;  %vm355_vm3 = vcmask 64512  }
  0x1b   : > { %574 = vset.pattern.permute.xlu0 %v672_v1  ;;  %575 = vset.pattern.permute.xlu1 %v672_v1  ;;  %s297_s23 = scalar_select %p296_p13, %s654_s27, 1  ;;  %v302_v2 = vld [vmem:[%s854_s1] sm:$0xff] }
  0x1c   : > { %311 = vperm.xlu0 %574, %v303_v0   ;;  %s492_s9 = sshll.u32 %s295_s22, 1  ;;  %v304_v3 = vld [vmem:[%s856_s3] sm:$0xff] }
  0x1d   : > { %s299_s10 = sadd.s32 %s492_s9, %s297_s23  ;;  %v306_v5 = vld [vmem:[%s858_s5] sm:$0xf] }
  0x1e   : > { %s493_s13 = sshll.u32 %s299_s10, 2  ;;  %352 = vperm.xlu1 %575, %v306_v5   ;;  %v307_v6 = vld [vmem:[%s859_s6] sm:$0xf] }
  0x1f   : > { %s301_s18 = scalar_lea.vmem %s853_s0, %s493_s13  ;;  %v305_v12 = vld [vmem:[%s857_s4] sm:$0xf]  ;;  %s498_s13 = sshll.u32 %s658_s28, 1 }
  0x20   : > { %v308_v4 = vld [vmem:[%s301_s18] sm:$0xf]  ;;  %s401_s17 = sadd.s32 %s654_s27, %s498_s13  ;;  %s491_s18 = sshll.u32 %s291_s16, 2 }
  0x21   : > { %494 = vmatpush.msk.msra.mxu0 %vm318_vm0, %v308_v4  ;;  %s499_s20 = sshll.u32 %s401_s17, 2  ;;  %v379_v15 = vmul.f32 0.5, %v308_v4  ;;  %s293_s9 = scalar_lea.vmem [#allocation2], %s491_s18 }
  0x22   : > { %495 = vmatmul.msk.f32.vlgmr.msra.gmra.mxu0 %vm314_vm1, %v302_v2  ;;  %s403_s23 = scalar_lea.hbm %s860_s7, %s499_s20  ;;  %s405_s10 = sshll.u32 %s293_s9, 4  ;;  %s406_s10 = int_to_ptr.vmem [resolvable:$true] %s405_s10 }
  0x23   : > { %s407_s2 = sshll.u32 %s403_s23, 4  ;;  %s391_s27 = scalar_lea.sflag [#allocation3], %s291_s16  ;;  %s408_s2 = int_to_ptr.hbm [resolvable:$true] %s407_s2 }
  0x24   : > { %345 = vperm.xlu0 %574, %v304_v3   ;;  %s590_s28 = sshra.s32 %s408_s2, 4  ;;  %s596_s18 = scalar_lea.hbm %s860_s7, 16  ;;  %s591_s28 = int_to_ptr.hbm [resolvable:$true] %s590_s28 }
  0x25   : > { %s592_s12 = scalar_lea.hbm %s591_s28, 4  ;;  %p597_p4 = scmp.lt.s32.totalorder %s591_s28, %s860_s7 }
  0x26   : > { %384 = vperm.xlu1 %575, %v307_v6   ;;  %p593_p0 = scmp.ne.s32.totalorder %s591_s28, %s592_s12  ;;  %p598_p5 = scmp.lt.s32.totalorder %s596_s18, %s592_s12 }
  0x28   : > { %p594_p1 = pnand %p593_p0, %p764_p3  ;;  %p599_p6 = por %p598_p5, %p597_p4 }
  0x2a   : > { %p595_p2 = pneg %p594_p1 }
  0x2c   : > { %p600_p7 = pnand %p599_p6, %p595_p2 }
  0x8e   : > { %v312_v7 = vpop.permute.xlu0 %311 }
  0x90   : > { %v353_v14 = vpop.permute.xlu1 %352 }
  0x96   : > { %v346_v10 = vpop.permute.xlu0 %345 }
  0x98   : > { %v385_v19 = vpop.permute.xlu1 %384 }
  0x9f   : > { %v339_v8 = vpop.f32.mrf.mxu0 }
  0xa0   : > { %v340_v9 = vadd.f32 %v339_v8, %v312_v7 }
  0xa2   : > { %vm342_vm2 = vcmp.ge.f32.partialorder %v340_v9, 0.0  ;;  %v348_v11 = vmul.f32 %v346_v10, %v340_v9 }
  0xa4   : > { %v349_v13 = vsel %vm342_vm2, %v340_v9, %v348_v11 }
  0xa5   : > { %374 = vmatpush.msra.mxu1 %v349_v13 }
  0xa6   : > { %496 = vmatmul.msk.f32.vlgmr.msra.gmra.mxu1 %vm355_vm3, %v305_v12 }
 0x123   : > { %v376_v16 = vpop.f32.mrf.mxu1 }
 0x124   : > { %v377_v17 = vadd.f32 %v376_v16, %v353_v14 }
 0x126   : > { %v380_v18 = vadd.f32 %v379_v15, %v377_v17 }
 0x128   : > { %v387_v20 = vmul.f32 %v385_v19, %v380_v18  ;;  %vm381_vm4 = vcmp.ge.f32.partialorder %v380_v18, 0.0 }
 0x12a   : > { %v388_v21 = vsel %vm381_vm4, %v380_v18, %v387_v20 }
 0x12b   : > { %389 = vst [vmem:[%s293_s9] sm:$0xf] %v388_v21 }
 0x12c   : > { %603 = shalt.err (!%p600_p7)
}
 0x12d   : > { %502 = dma.vmem_to_hbm [thread:$0]  (%p764_p3), %s406_s10, 64, %s408_s2, %s391_s27  }
 0x12e PF: > { %p508_p9 = scmp.ge.s32.totalorder %s670_s8, 2  ;;  %s419_s16 = sand.u32 1, %s642_s24  }
 0x12f   : > { %s420_s22 = scalar_lea.sflag [#allocation3], %s419_s16 }
 0x130   : > { %p505_p10 = pnand %p508_p9, %p773_p8 }
 0x132   : > { %p506_p11 = pneg %p505_p10 }
 0x134   : > { %637 = dma.done.wait (%p506_p11), %s420_s22, 64  }
 0x135   : > { %639 = vsyncadd (%p506_p11), %s420_s22, 4294967232  ;;  %s20_s8 = sadd.s32 1, %s670_s8   ;;  %s867_s14 = sld [smem:[#allocation5_spill]] }
 0x136   : > { %p17_p12 = scmp.ge.s32.totalorder %s20_s8, 6   ;;  %s868_s24 = smov %s646_s25 }
 0x137   : > { %s869_s25 = smov %s650_s26  ;;  %s870_s26 = smov %s782_s19 }
 0x138   : > { %s871_s27 = smov %s662_s29  ;;  %s872_s28 = smov %s666_s30 }
 0x139   : > { %s873_s29 = smov %s876_s11  ;;  %19 = sbr.rel (!%p17_p12) target bundleno = 7 (0x7), region = 83 }
 0x13b   : > { %s874_s30 = smov %s867_s14 }
 0x13e   :  { %426 = vsyncpa [#allocation3], 1 }
 0x13f   :  { %428 = vsyncpa [#allocation3 + $0x1], 1 }

</bundles_post_ra>
